<compile_context>
chip_gen: v7x
topology: tpu7x:2x2x1
jax: 0.10.0
libtpu: 0.0.40
codegen_flags: <defaults>
</compile_context>

<pallas_src>
import functools

import numpy as np
import jax
import jax.numpy as jnp
from jax.experimental import pallas as pl
from jax.experimental.pallas import tpu as pltpu

# small shapes consistent with MLP(dim, inter_dim); world_size = 1
BATCH = 2
SEQ = 8
DIM = 128        # dim
INTER_DIM = 256  # inter_dim


# ---------------- Pallas kernel ----------------

def mlp_kernel(x_ref, w13_ref, w2_ref, o_ref, acc_ref, *, ti):
    k = pl.program_id(1)

    @pl.when(k == 0)
    def _():
        acc_ref[...] = jnp.zeros_like(acc_ref)

    x = x_ref[...]                                                      # (tm, D) bf16
    # Fused gate/up projection: one MXU push/drain instead of two.  This block's
    # columns are [w1_k | w3_k]; both halves are ti wide (multiple of 128), so the
    # slices below are lane-aligned.
    h13 = jnp.dot(x, w13_ref[...], preferred_element_type=jnp.float32)  # (tm, 2*ti) f32
    h1 = h13[:, :ti]
    h3 = h13[:, ti:]

    # SwiGLU gating in f32; approx reciprocal keeps the divide on the EUP slot.
    sig = pl.reciprocal(1.0 + jnp.exp(-h1), approx=True)
    g = (h1 * sig) * h3                                                 # (tm, ti) f32

    # Down projection chunk: bf16 MXU inputs, f32 accumulation across k.
    acc_ref[...] += jnp.dot(g.astype(jnp.bfloat16), w2_ref[...],
                            preferred_element_type=jnp.float32)

    @pl.when(k == pl.num_programs(1) - 1)
    def _():
        o_ref[...] = acc_ref[...].astype(o_ref.dtype)


# ---------------- one-time parameter prep (NOT per-forward) ----------------

def prepare_mlp_params(w1, w2, w3, *, ti):
    """(out, in) -> (in, out), bf16 cast, and interleave w1/w3 per inter_dim chunk
    so every k-step reads one contiguous (D, 2*ti) block [w1_k | w3_k]."""
    I, D = w1.shape
    assert w3.shape == (I, D) and w2.shape == (D, I)
    assert I % ti == 0 and ti % 128 == 0
    nk = I // ti
    w1t = jnp.transpose(w1).astype(jnp.bfloat16)          # (D, I)
    w3t = jnp.transpose(w3).astype(jnp.bfloat16)          # (D, I)
    w13t = jnp.concatenate(
        [w1t.reshape(D, nk, ti), w3t.reshape(D, nk, ti)], axis=2
    ).reshape(D, 2 * I)                                    # chunk k cols = [w1_k | w3_k]
    w2t = jnp.transpose(w2).astype(jnp.bfloat16)           # (I, D)
    return w13t, w2t


# ---------------- wrapper ----------------

def mlp_forward(x, w13t, w2t, *, ti, tm=None):
    """x: (..., D). w13t: (D, 2*I) interleaved bf16; w2t: (I, D) bf16."""
    orig_shape = x.shape
    D = orig_shape[-1]
    I = w2t.shape[0]
    assert w13t.shape == (D, 2 * I) and w2t.shape == (I, D)
    assert I % ti == 0
    nk = I // ti

    xf = x.reshape(-1, D)
    T = xf.shape[0]

    # Token tile: keep the MXU M dim full.  128 fills v5e's 4x128x128 MXU;
    # prefill on v6e/v7x prefers 256-512 (pass tm explicitly there).
    if tm is None:
        tm = 256 if T >= 256 else 128
    T_pad = ((T + tm - 1) // tm) * tm
    if T_pad != T:
        xf = jnp.pad(xf, ((0, T_pad - T), (0, 0)))          # zero tokens -> zero output rows
    xf = xf.astype(jnp.bfloat16)

    out = pl.pallas_call(
        functools.partial(mlp_kernel, ti=ti),
        out_shape=jax.ShapeDtypeStruct((T_pad, D), x.dtype),
        grid_spec=pltpu.PrefetchScalarGridSpec(
            num_scalar_prefetch=0,
            grid=(T_pad // tm, nk),                          # reduction (inter_dim) axis last
            in_specs=[
                pl.BlockSpec((tm, D), lambda i, k: (i, 0)),      # x token tile
                pl.BlockSpec((D, 2 * ti), lambda i, k: (0, k)),  # [w1_k | w3_k] chunk
                pl.BlockSpec((ti, D), lambda i, k: (k, 0)),      # w2 chunk
            ],
            out_specs=pl.BlockSpec((tm, D), lambda i, k: (i, 0)),
            scratch_shapes=[pltpu.VMEM((tm, D), jnp.float32)],   # f32 accumulator
        ),
        compiler_params=pltpu.CompilerParams(
            dimension_semantics=("parallel", "arbitrary"),
            # Sized for v7x's 64 MiB/TC with headroom; well under v5e/v6e physical.
            vmem_limit_bytes=48 * 1024 * 1024,
        ),
    )(xf, w13t, w2t)

    if T_pad != T:
        out = out[:T]
    return out.reshape(orig_shape)


# ---------------- pure-JAX reference (f32, matches the PyTorch module) ----------------

def mlp_reference(x, w1, w2, w3):
    orig_shape = x.shape
    xf = x.reshape(-1, orig_shape[-1])
    h1 = xf @ w1.T
    h3 = xf @ w3.T
    y = (jax.nn.silu(h1) * h3) @ w2.T
    return y.reshape(orig_shape)


# ---------------- main ----------------

if __name__ == "__main__":
    key = jax.random.PRNGKey(0)
    k1, k2, k3, k4 = jax.random.split(key, 4)
    s = 0.05
    w1 = s * jax.random.normal(k1, (INTER_DIM, DIM), jnp.float32)   # (out, in)
    w2 = s * jax.random.normal(k2, (DIM, INTER_DIM), jnp.float32)   # (out, in)
    w3 = s * jax.random.normal(k3, (INTER_DIM, DIM), jnp.float32)   # (out, in)
    x = jax.random.normal(k4, (BATCH, SEQ, DIM), jnp.float32)

    # ti = inter_dim chunk per reduction step (multiple of 128).  128 here so the
    # toy I=256 exercises the 2-step accumulator path; tune 256-512 at real sizes.
    ti = 128
    w13t, w2t = prepare_mlp_params(w1, w2, w3, ti=ti)               # one-time prep

    out = jax.block_until_ready(mlp_forward(x, w13t, w2t, ti=ti))
    ref = jax.block_until_ready(mlp_reference(x, w1, w2, w3))
    # Tolerance relaxed for the bf16 MXU fast path (f32 accumulation retained).
    np.testing.assert_allclose(np.asarray(out), np.asarray(ref), rtol=2e-2, atol=2e-2)
    print("KERNEL_OK")
</pallas_src>

<mosaic_0001>
module attributes {stable_mosaic.version = 11 : i64} {
  func.func @mlp_kernel(%arg0: i32, %arg1: i32, %arg2: memref<128x128xbf16, #tpu.memory_space<vmem>>, %arg3: memref<128x256xbf16, #tpu.memory_space<vmem>>, %arg4: memref<128x128xbf16, #tpu.memory_space<vmem>>, %arg5: memref<128x128xf32, #tpu.memory_space<vmem>>, %arg6: memref<128x128xf32, #tpu.memory_space<vmem>>) attributes {dimension_semantics = [#tpu.dimension_semantics<parallel>, #tpu.dimension_semantics<arbitrary>], iteration_bounds = array<i64: 1, 2>, scalar_prefetch = 0 : i64, scratch_operands = 1 : i64, tpu.core_type = #tpu.core_type<tc>, window_params = [{transform_indices = @transform_0, window_bounds = array<i64: 128, 128>}, {transform_indices = @transform_1, window_bounds = array<i64: 128, 256>}, {transform_indices = @transform_2, window_bounds = array<i64: 128, 128>}, {transform_indices = @transform_3, window_bounds = array<i64: 128, 128>}]} {
    %c0_i32 = arith.constant 0 : i32
    %0 = arith.cmpi eq, %arg1, %c0_i32 : i32
    %1 = arith.extui %0 : i1 to i32
    %c0_i32_0 = arith.constant 0 : i32
    %2 = arith.cmpi ne, %1, %c0_i32_0 : i32
    scf.if %2 {
      %cst_14 = arith.constant 0.000000e+00 : f32
      %25 = vector.broadcast %cst_14 : f32 to vector<128x128xf32>
      %c0_15 = arith.constant 0 : index
      %c0_16 = arith.constant 0 : index
      %26 = vector.load %arg6[%c0_15, %c0_16] : memref<128x128xf32, #tpu.memory_space<vmem>>, vector<128x128xf32>
      tpu.vector_store %arg6[%c0_15, %c0_16], %25 {strides = array<i32>} : memref<128x128xf32, #tpu.memory_space<vmem>>, vector<128x128xf32>,
    } else {
    }
    %c0 = arith.constant 0 : index
    %c0_1 = arith.constant 0 : index
    %3 = vector.load %arg2[%c0, %c0_1] : memref<128x128xbf16, #tpu.memory_space<vmem>>, vector<128x128xbf16>
    %c0_2 = arith.constant 0 : index
    %c0_3 = arith.constant 0 : index
    %4 = vector.load %arg3[%c0_2, %c0_3] : memref<128x256xbf16, #tpu.memory_space<vmem>>, vector<128x256xbf16>
    %cst = arith.constant dense<0.000000e+00> : vector<128x256xf32>
    %5 = tpu.matmul %3, %4, %cst {dimension_numbers = #tpu.dot_dimension_numbers<[1], [0], [0], [1], [0, 0, 1, 1], [], []>} : vector<128x128xbf16>, vector<128x256xbf16>, vector<128x256xf32> -> vector<128x256xf32>
    %6 = vector.extract_strided_slice %5 {offsets = [0, 0], sizes = [128, 128], strides = [1, 1]} : vector<128x256xf32> to vector<128x128xf32>
    %7 = vector.extract_strided_slice %5 {offsets = [0, 128], sizes = [128, 128], strides = [1, 1]} : vector<128x256xf32> to vector<128x128xf32>
    %cst_4 = arith.constant 0.000000e+00 : f32
    %8 = vector.broadcast %cst_4 : f32 to vector<128x128xf32>
    %9 = arith.subf %8, %6 : vector<128x128xf32>
    %10 = math.exp %9 : vector<128x128xf32>
    %cst_5 = arith.constant 1.000000e+00 : f32
    %11 = vector.broadcast %cst_5 : f32 to vector<128x128xf32>
    %12 = arith.addf %11, %10 : vector<128x128xf32>
    %13 = tpu.reciprocal %12 {approx = true} : vector<128x128xf32> -> vector<128x128xf32>
    %14 = arith.mulf %6, %13 : vector<128x128xf32>
    %15 = arith.mulf %14, %7 : vector<128x128xf32>
    %c0_6 = arith.constant 0 : index
    %c0_7 = arith.constant 0 : index
    %16 = vector.load %arg6[%c0_6, %c0_7] : memref<128x128xf32, #tpu.memory_space<vmem>>, vector<128x128xf32>
    %17 = arith.truncf %15 : vector<128x128xf32> to vector<128x128xbf16>
    %c0_8 = arith.constant 0 : index
    %c0_9 = arith.constant 0 : index
    %18 = vector.load %arg4[%c0_8, %c0_9] : memref<128x128xbf16, #tpu.memory_space<vmem>>, vector<128x128xbf16>
    %cst_10 = arith.constant dense<0.000000e+00> : vector<128x128xf32>
    %19 = tpu.matmul %17, %18, %cst_10 {dimension_numbers = #tpu.dot_dimension_numbers<[1], [0], [0], [1], [0, 0, 1, 1], [], []>} : vector<128x128xbf16>, vector<128x128xbf16>, vector<128x128xf32> -> vector<128x128xf32>
    %20 = arith.addf %16, %19 : vector<128x128xf32>
    %c0_11 = arith.constant 0 : index
    %c0_12 = arith.constant 0 : index
    %21 = vector.load %arg6[%c0_11, %c0_12] : memref<128x128xf32, #tpu.memory_space<vmem>>, vector<128x128xf32>
    tpu.vector_store %arg6[%c0_11, %c0_12], %20 {strides = array<i32>} : memref<128x128xf32, #tpu.memory_space<vmem>>, vector<128x128xf32>,
    %c1_i32 = arith.constant 1 : i32
    %22 = arith.cmpi eq, %arg1, %c1_i32 : i32
    %23 = arith.extui %22 : i1 to i32
    %c0_i32_13 = arith.constant 0 : i32
    %24 = arith.cmpi ne, %23, %c0_i32_13 : i32
    scf.if %24 {
      %c0_14 = arith.constant 0 : index
      %c0_15 = arith.constant 0 : index
      %25 = vector.load %arg6[%c0_14, %c0_15] : memref<128x128xf32, #tpu.memory_space<vmem>>, vector<128x128xf32>
      %c0_16 = arith.constant 0 : index
      %c0_17 = arith.constant 0 : index
      %26 = vector.load %arg5[%c0_16, %c0_17] : memref<128x128xf32, #tpu.memory_space<vmem>>, vector<128x128xf32>
      tpu.vector_store %arg5[%c0_16, %c0_17], %25 {strides = array<i32>} : memref<128x128xf32, #tpu.memory_space<vmem>>, vector<128x128xf32>,
    } else {
    }
    return
  }
  func.func @transform_0(%arg0: i32, %arg1: i32) -> (i32, i32) {
    %c0_i32 = arith.constant 0 : i32
    %c0_i32_0 = arith.constant 0 : i32
    return %arg0, %c0_i32 : i32, i32
  }
  func.func @transform_1(%arg0: i32, %arg1: i32) -> (i32, i32) {
    %c0_i32 = arith.constant 0 : i32
    %c0_i32_0 = arith.constant 0 : i32
    return %c0_i32, %arg1 : i32, i32
  }
  func.func @transform_2(%arg0: i32, %arg1: i32) -> (i32, i32) {
    %c0_i32 = arith.constant 0 : i32
    %c0_i32_0 = arith.constant 0 : i32
    return %arg1, %c0_i32 : i32, i32
  }
  func.func @transform_3(%arg0: i32, %arg1: i32) -> (i32, i32) {
    %c0_i32 = arith.constant 0 : i32
    %c0_i32_0 = arith.constant 0 : i32
    return %arg0, %c0_i32 : i32, i32
  }
}

</mosaic_0001>

<bundles_post_ra>
// kernel: tpu_custom_call.1
= control target key start
LH: loop header
LB: loop body
LE: loop exit
PB: predicated region body
PF: predicated region fallthrough
CT: control target
= control target key end

     0   :  { %8 = vsyncpa [#allocation4], 0  ;;  %s1867_s0 = inlined_call_operand.hbm [shape: bf16[128,128], index: 0, kind: input, shape index: {}]   ;;  %s1868_s1 = inlined_call_operand.hbm [shape: bf16[128,512], index: 1, kind: input, shape index: {}]   ;;  %s1869_s2 = inlined_call_operand.hbm [shape: bf16[256,128], index: 2, kind: input, shape index: {}]   ;;  %s1870_s3 = inlined_call_operand.hbm [shape: f32[128,128], index: 3, kind: output, shape index: {}]  }
   0x1   :  { %9 = vsyncpa [#allocation7], 0 }
   0x2   :  { %11 = vsyncpa [#allocation7 + $0x1], 0 }
   0x3   :  { %12 = vsyncpa [#allocation5], 0  ;;  %s1524_s12 = smov 0   ;;  %s1526_s13 = smov 0  }
   0x4   :  { %s1528_s14 = smov 0   ;;  %s1530_s15 = smov 0  }
   0x5   :  { %s1532_s16 = smov 0   ;;  %s1534_s17 = smov 0  }
   0x6 LB: > { %s27_s18 = sadd.s32 1, %s1485_s16  ;;  %s63_s19 = sadd.s32 1, %s1477_s14  ;;  %s1489_s17 = sphi %s1534_s17, %s18_s17   ;;  %s1485_s16 = sphi %s1532_s16, %s1892_s16   ;;  %s1481_s15 = sphi %s1530_s15, %s1891_s15   ;;  %s1477_s14 = sphi %s1528_s14, %s1890_s14   ;;  %s1473_s13 = sphi %s1526_s13, %s1889_s13   ;;  %s1469_s12 = sphi %s1524_s12, %s1888_s12  }
   0x7   : > { %p28_p0 = scmp.ge.s32.totalorder %s27_s18, 2  ;;  %p70_p1 = scmp.ne.s32.totalorder %s1477_s14, %s1473_s13 }
   0x8   : > { %p71_p2 = scmp.eq.s32.totalorder %s1489_s17, 0  ;;  %p1150_p4 = scmp.lt.s32.totalorder %s1489_s17, 2 }
   0x9   : > { %s1894_s18 = smov (%p28_p0, %s27_s18), 0  ;;  %s168_s21 = sand.u32 1, %s1489_s17  }
   0xa   : > { %p72_p3 = por %p71_p2, %p70_p1  ;;  %s60_s20 = ssub.s32 %s1485_s16, %s1894_s18 }
   0xb   : > { %p61_p5 = scmp.eq.s32.totalorder %s60_s20, 0  ;;  %s170_s22 = sand.u32 1, %s1477_s14  }
   0xc   : > { %s1076_s23 = sshll.u32 %s1485_s16, 7  ;;  %s1028_s25 = sshll.u32 %s170_s22, 7 }
   0xd   : > { %s1568_s24 = scalar_select %p61_p5, %s1477_s14, %s63_s19  }
   0xe   : > { %s1575_s28 = scalar_lea.hbm %s1868_s1, %s1076_s23  ;;  %p1577_p6 = pnand %p1150_p4, %p72_p3 }
   0xf   : > { %s172_s30 = scalar_lea.vmem [#allocation6], %s1028_s25  ;;  %s1583_s5 = scalar_lea.sflag [#allocation7], %s168_s21 }
  0x10   : > { %s1877_s29 = scalar_select %p1577_p6, 1, 0 }
  0x11   : > { %s179_s4 = sshll.u32 %s172_s30, 4  ;;  %s1317_s6 = scalar_lea.hbm %s1575_s28, 2048  ;;  %s1581_s4 = int_to_ptr.vmem [resolvable:$true] %s179_s4 }
  0x12   : > { %p1318_p7 = scmp.ne.s32.totalorder %s1575_s28, %s1317_s6  ;;  %p1872_p8 = pneg %p1577_p6 }
  0x13   : > { %s1322_s9 = scalar_lea.hbm %s1868_s1, 4096  ;;  %p1323_p11 = scmp.lt.u32.totalorder %s1575_s28, %s1868_s1 }
  0x14   : > { %p1320_p9 = pnand %p1872_p8, %p1318_p7  ;;  %p1324_p12 = scmp.lt.u32.totalorder %s1322_s9, %s1317_s6 }
  0x15   : > { %p1326_p0 = scmp.lt.u32.totalorder %s1317_s6, %s1575_s28 }
  0x16   : > { %p1321_p10 = pneg %p1320_p9  ;;  %p1325_p13 = por %p1324_p12, %p1323_p11 }
  0x18   : > { %p1327_p1 = por %p1326_p0, %p1325_p13 }
  0x1a   : > { %p1328_p2 = pnand %p1327_p1, %p1321_p10 }
  0x1c   : > { %1331 = shalt.err (!%p1328_p2)
}
  0x1d   : > { %s1332_s19 = scalar_lea.vmem %s1581_s4, 2048  ;;  %s1491_s20 = smov [#allocation6]  }
  0x1e   : > { %p1333_p3 = scmp.ne.s32.totalorder %s1581_s4, %s1332_s19  ;;  %s1337_s21 = sshll.u32 %s1491_s20, 4  ;;  %s1338_s21 = int_to_ptr.vmem [resolvable:$false] %s1337_s21 }
  0x1f   : > { %s1339_s23 = scalar_lea.vmem %s1338_s21, 4096  ;;  %p1340_p7 = scmp.lt.s32.totalorder %s1581_s4, %s1338_s21 }
  0x20   : > { %p1335_p4 = pnand %p1333_p3, %p1872_p8  ;;  %p1341_p9 = scmp.lt.s32.totalorder %s1339_s23, %s1332_s19 }
  0x22   : > { %p1336_p5 = pneg %p1335_p4  ;;  %p1342_p11 = por %p1341_p9, %p1340_p7 }
  0x24   : > { %p1343_p12 = pnand %p1342_p11, %p1336_p5 }
  0x26   : > { %1346 = shalt.err (!%p1343_p12)
}
  0x27   : > { %s1492_s25 = smov 256   ;;  %s1493_s26 = smov 128  }
  0x28   : > { %s1494_s27 = smov 8   ;;  %s1612_s30 = sadd.s32 4294967295, %s1489_s17  }
  0x29   : > { %1145 = dma.hbm_to_vmem [thread:$0]  (!%p1577_p6), %s1575_s28, 2048, %s1581_s4, %s1583_s5, %s1492_s25, %s1493_s26, %s1494_s27  }
  0x2a   : > { %p76_p10 = scmp.ne.s32.totalorder %s1473_s13, %s1469_s12  ;;  %p1871_p13 = scmp.eq.s32.totalorder %s1612_s30, 0 }
  0x2b   : > { %p1025_p0 = scmp.ge.s32.totalorder %s1489_s17, 1  ;;  %p139_p1 = scmp.lt.s32.totalorder %s1489_s17, 3 }
  0x2c   : > { %p1621_p2 = por %p1871_p13, %p76_p10  ;;  %s1495_s28 = smov [#allocation3]  }
  0x2d   : > { %p1625_p3 = pnand %p1025_p0, %p139_p1  ;;  %s154_s4 = sshll.u32 %s1495_s28, 4  ;;  %s1629_s4 = int_to_ptr.vmem [resolvable:$true] %s154_s4 }
  0x2e   : > { %s1878_s6 = scalar_select %p1621_p2, 1, 0 }
  0x2f   : > { %s1879_s7 = scalar_select %p1625_p3, 1, 0 }
  0x30   : > { %p1138_p4 = pneg %p1625_p3  ;;  %s1031_s12 = sshll.u32 %s170_s22, 6 }
  0x31   : > { %s1077_s8 = sshll.u32 %s1485_s16, 10  ;;  %s193_s20 = scalar_lea.vmem [#allocation8], %s1031_s12 }
  0x32   : > { %p1638_p5 = pnand %p1138_p4, %p1871_p13  ;;  %s1645_s19 = scalar_lea.hbm %s1869_s2, %s1077_s8 }
  0x33   : > { %s200_s21 = sshll.u32 %s193_s20, 4  ;;  %s1347_s22 = scalar_lea.hbm %s1867_s0, 1024  ;;  %s1647_s21 = int_to_ptr.vmem [resolvable:$true] %s200_s21 }
  0x34   : > { %p1348_p7 = scmp.ne.s32.totalorder %s1867_s0, %s1347_s22  ;;  %p1349_p9 = pneg %p1638_p5 }
  0x35   : > { %p1354_p10 = scmp.lt.u32.totalorder %s1347_s22, %s1867_s0 }
  0x36   : > { %p1350_p11 = pnand %p1349_p9, %p1348_p7 }
  0x38   : > { %p1351_p12 = pneg %p1350_p11 }
  0x3a   : > { %p1356_p0 = pnand %p1354_p10, %p1351_p12 }
  0x3c   : > { %1359 = shalt.err (!%p1356_p0)
}
  0x3d   : > { %s1360_s12 = scalar_lea.vmem %s1629_s4, 1024  ;;  %p1368_p8 = scmp.lt.s32.totalorder %s1629_s4, %s1629_s4 }
  0x3e   : > { %p1361_p1 = scmp.ne.s32.totalorder %s1629_s4, %s1360_s12  ;;  %p1369_p2 = scmp.lt.s32.totalorder %s1360_s12, %s1360_s12 }
  0x40   : > { %p1363_p4 = pnand %p1361_p1, %p1349_p9  ;;  %p1370_p3 = por %p1369_p2, %p1368_p8 }
  0x42   : > { %p1364_p13 = pneg %p1363_p4 }
  0x44   : > { %p1371_p6 = pnand %p1370_p3, %p1364_p13 }
  0x46   : > { %1374 = shalt.err (!%p1371_p6)
}
  0x47   : > { %s1496_s8 = smov 64   ;;  %s1497_s11 = smov 4  }
  0x48   : > { %1141 = dma.hbm_to_vmem [thread:$0]  (!%p1638_p5), %s1867_s0, 1024, %s1629_s4, [#allocation4], %s1496_s8, %s1496_s8, %s1497_s11  }
  0x49   : > { %s1375_s25 = scalar_lea.hbm %s1645_s19, 1024  ;;  %p1881_p6 = scmp.ne.s32.totalorder %s1877_s29, 0 }
  0x4a   : > { %p1376_p8 = scmp.ne.s32.totalorder %s1645_s19, %s1375_s25  ;;  %s1380_s27 = scalar_lea.hbm %s1869_s2, 2048 }
  0x4b   : > { %p1882_p13 = pneg %p1881_p6  ;;  %p1381_p7 = scmp.lt.u32.totalorder %s1645_s19, %s1869_s2 }
  0x4c   : > { %p1382_p9 = scmp.lt.u32.totalorder %s1380_s27, %s1375_s25  ;;  %p1384_p12 = scmp.lt.u32.totalorder %s1375_s25, %s1645_s19 }
  0x4d   : > { %p1378_p2 = pnand %p1376_p8, %p1882_p13 }
  0x4e   : > { %p1383_p11 = por %p1382_p9, %p1381_p7 }
  0x4f   : > { %p1379_p3 = pneg %p1378_p2 }
  0x50   : > { %p1385_p10 = por %p1384_p12, %p1383_p11 }
  0x52   : > { %p1386_p0 = pnand %p1385_p10, %p1379_p3 }
  0x54   : > { %1389 = shalt.err (!%p1386_p0)
}
  0x55   : > { %s1390_s4 = scalar_lea.vmem %s1647_s21, 1024  ;;  %p1883_p1 = pmov %p1882_p13 }
  0x56   : > { %p1391_p5 = scmp.ne.s32.totalorder %s1647_s21, %s1390_s4  ;;  %s1498_s9 = smov [#allocation8]  }
  0x57   : > { %s1395_s12 = sshll.u32 %s1498_s9, 4  ;;  %s1396_s12 = int_to_ptr.vmem [resolvable:$false] %s1395_s12 }
  0x58   : > { %p1393_p4 = pnand %p1391_p5, %p1883_p1  ;;  %s1397_s20 = scalar_lea.vmem %s1396_s12, 2048 }
  0x59   : > { %p1398_p13 = scmp.lt.s32.totalorder %s1647_s21, %s1396_s12  ;;  %p1399_p2 = scmp.lt.s32.totalorder %s1397_s20, %s1390_s4 }
  0x5a   : > { %p1394_p8 = pneg %p1393_p4 }
  0x5b   : > { %p1400_p7 = por %p1399_p2, %p1398_p13 }
  0x5d   : > { %p1401_p9 = pnand %p1400_p7, %p1394_p8 }
  0x5f   : > { %1404 = shalt.err (!%p1401_p9)
}
  0x60   : > { %1148 = dma.hbm_to_vmem [thread:$0]  (!%p1881_p6), %s1645_s19, 1024, %s1647_s21, %s1583_s5, %s1496_s8, %s1496_s8, %s1497_s11  }
  0x61   : > { %p1884_p3 = scmp.ne.s32.totalorder %s1879_s7, 0 }
  0x62   : > { %p1885_p11 = scmp.eq.s32.totalorder (!%p1884_p3), %s1612_s30, 0 }
  0x63   : > { %212 = sbr.rel (%p1884_p3) target bundleno = 711 (0x2c7), region = 32 }
  0x6a   : > { %1456 = dma.done.wait (%p1885_p11), [#allocation4], 1024   ;;  %p1886_p12 = pmov %p1885_p11 }
  0x6b   : > { %s218_s29 = sand.u32 1, %s1612_s30   ;;  %s220_s23 = sand.u32 1, %s1473_s13  }
  0x6c   : > { %1458 = vsyncadd (%p1886_p12), [#allocation4], 4294966272  ;;  %s1036_s25 = sshll.u32 %s220_s23, 7  ;;  %s219_s22 = scalar_lea.sflag [#allocation7], %s218_s29 }
  0x6d   : > { %s1708_s26 = scalar_lea.vmem [#allocation6], %s1036_s25  ;;  %p1887_p10 = scmp.ne.s32.totalorder %s1878_s6, 0 }
  0x6f   : > { %1460 = dma.done.wait (%p1887_p10), %s219_s22, 3072  }
  0x70   : > { %1462 = vsyncadd (%p1887_p10), %s219_s22, 4294964224  ;;  %s1037_s5 = sshll.u32 %s220_s23, 6  ;;  %p1038_p6 = scmp.ne.s32.totalorder %s1481_s15, 0 }
  0x71   : > { %s1714_s7 = scalar_lea.vmem [#allocation8], %s1037_s5  ;;  %v1499_v0 = vmov (!%p1038_p6), 0.0  }
  0x72   : > { %262 = sbr.rel (%p1038_p6) target bundleno = 122 (0x7a), region = 48  ;;  %263 = vst [vmem:[#allocation2] sm:$0xff] (!%p1038_p6), %v1499_v0  ;;  %264 = vst [vmem:[#allocation2 + $0x8] sm:$0xff] (!%p1038_p6), %v1499_v0 }
  0x73   : > { %265 = vst [vmem:[#allocation2 + $0x10] sm:$0xff] (!%p1038_p6), %v1499_v0  ;;  %266 = vst [vmem:[#allocation2 + $0x18] sm:$0xff] (!%p1038_p6), %v1499_v0 }
  0x74   : > { %267 = vst [vmem:[#allocation2 + $0x20] sm:$0xff] (!%p1038_p6), %v1499_v0  ;;  %268 = vst [vmem:[#allocation2 + $0x28] sm:$0xff] (!%p1038_p6), %v1499_v0 }
  0x75   : > { %269 = vst [vmem:[#allocation2 + $0x30] sm:$0xff] (!%p1038_p6), %v1499_v0  ;;  %270 = vst [vmem:[#allocation2 + $0x38] sm:$0xff] (!%p1038_p6), %v1499_v0 }
  0x76   : > { %271 = vst [vmem:[#allocation2 + $0x40] sm:$0xff] (!%p1038_p6), %v1499_v0  ;;  %272 = vst [vmem:[#allocation2 + $0x48] sm:$0xff] (!%p1038_p6), %v1499_v0 }
  0x77   : > { %273 = vst [vmem:[#allocation2 + $0x50] sm:$0xff] (!%p1038_p6), %v1499_v0  ;;  %274 = vst [vmem:[#allocation2 + $0x58] sm:$0xff] (!%p1038_p6), %v1499_v0 }
  0x78   : > { %275 = vst [vmem:[#allocation2 + $0x60] sm:$0xff] (!%p1038_p6), %v1499_v0  ;;  %276 = vst [vmem:[#allocation2 + $0x68] sm:$0xff] (!%p1038_p6), %v1499_v0 }
  0x79   : > { %277 = vst [vmem:[#allocation2 + $0x70] sm:$0xff] %v1499_v0  ;;  %278 = vst [vmem:[#allocation2 + $0x78] sm:$0xff] %v1499_v0 }
  0x7a PF: > { %v1213_v1 = vld [vmem:[%s1708_s26 + $0x4] ss:$8 sps:$4 sm:$0xff]   ;;  %v1215_v2 = vld [vmem:[%s1708_s26] ss:$8 sps:$4 sm:$0xff]   ;;  %v1500_v3 = vmov 0   ;;  %v1239_v20 = vld [vmem:[#allocation3 + $0x10] sm:$0xff]  }
  0x7b   : > { %471 = vmatprep.mubr.bf16.mxu0 %v1500_v3  ;;  %439 = vmatprep.subr.bf16.mxu0 %v1213_v1  ;;  %v1216_v4 = vld [vmem:[%s1708_s26 + $0x14] ss:$8 sps:$4 sm:$0xff]   ;;  %v1218_v5 = vld [vmem:[%s1708_s26 + $0x10] ss:$8 sps:$4 sm:$0xff]   ;;  %v1219_v6 = vld [vmem:[%s1708_s26 + $0x24] ss:$8 sps:$4 sm:$0xff]  }
  0x7c   : > { %440 = vmatpush1.bf16.msra.mxu0 %v1215_v2  ;;  %v1221_v7 = vld [vmem:[%s1708_s26 + $0x20] ss:$8 sps:$4 sm:$0xff]   ;;  %v1222_v8 = vld [vmem:[%s1708_s26 + $0x34] ss:$8 sps:$4 sm:$0xff]   ;;  %v1224_v9 = vld [vmem:[%s1708_s26 + $0x30] ss:$8 sps:$4 sm:$0xff]  }
  0x7d   : > { %441 = vmatprep.subr.bf16.mxu0 %v1216_v4  ;;  %v1225_v10 = vld [vmem:[%s1708_s26 + $0x44] ss:$8 sps:$4 sm:$0xff]   ;;  %v1227_v11 = vld [vmem:[%s1708_s26 + $0x40] ss:$8 sps:$4 sm:$0xff]   ;;  %v1228_v12 = vld [vmem:[%s1708_s26 + $0x54] ss:$8 sps:$4 sm:$0xff]  }
  0x7e   : > { %v1230_v13 = vld [vmem:[%s1708_s26 + $0x50] ss:$8 sps:$4 sm:$0xff]   ;;  %v1231_v14 = vld [vmem:[%s1708_s26 + $0x64] ss:$8 sps:$4 sm:$0xff]   ;;  %v1233_v15 = vld [vmem:[%s1708_s26 + $0x60] ss:$8 sps:$4 sm:$0xff]  }
  0x7f   : > { %v1234_v16 = vld [vmem:[%s1708_s26 + $0x74] ss:$8 sps:$4 sm:$0xff]   ;;  %v1236_v17 = vld [vmem:[%s1708_s26 + $0x70] ss:$8 sps:$4 sm:$0xff]   ;;  %v1237_v18 = vld [vmem:[#allocation3] sm:$0xff]   ;;  %p1071_p0 = scmp.ne.s32.totalorder %s1481_s15, 1 }
  0x80   : > { %442 = vmatpush1.bf16.msra.mxu0 %v1218_v5  ;;  %v1238_v19 = vld [vmem:[#allocation3 + $0x8] sm:$0xff]   ;;  %v1240_v21 = vld [vmem:[#allocation3 + $0x18] sm:$0xff]   ;;  %v1241_v22 = vld [vmem:[#allocation3 + $0x20] sm:$0xff]  }
  0x81   : > { %443 = vmatprep.subr.bf16.mxu0 %v1219_v6  ;;  %v1242_v23 = vld [vmem:[#allocation3 + $0x28] sm:$0xff]   ;;  %v1243_v24 = vld [vmem:[#allocation3 + $0x30] sm:$0xff]   ;;  %v1244_v25 = vld [vmem:[#allocation3 + $0x38] sm:$0xff]  }
  0x82   : > { %v1245_v26 = vld [vmem:[%s1714_s7] sm:$0xff]   ;;  %v1246_v27 = vld [vmem:[%s1714_s7 + $0x8] sm:$0xff]   ;;  %v1247_v28 = vld [vmem:[%s1714_s7 + $0x10] sm:$0xff]  }
  0x83   : > { %1094 = vmatprep.subr.bf16.mxu1 %v1245_v26  ;;  %v1248_v29 = vld [vmem:[%s1714_s7 + $0x18] sm:$0xff]   ;;  %v1249_v30 = vld [vmem:[%s1714_s7 + $0x20] sm:$0xff]   ;;  %v1250_v31 = vld [vmem:[%s1714_s7 + $0x28] sm:$0xff]  }
  0x84   : > { %444 = vmatpush1.bf16.msra.mxu0 %v1221_v7  ;;  %1095 = vmatpush3.bf16.msra.mxu1 %v1245_v26  ;;  %v1251_v32 = vld [vmem:[%s1714_s7 + $0x30] sm:$0xff]   ;;  %v1252_v33 = vld [vmem:[%s1714_s7 + $0x38] sm:$0xff]  }
  0x85   : > { %445 = vmatprep.subr.bf16.mxu0 %v1222_v8  ;;  %1096 = vmatprep.subr.bf16.mxu1 %v1246_v27 }
  0x88   : > { %446 = vmatpush1.bf16.msra.mxu0 %v1224_v9  ;;  %1097 = vmatpush3.bf16.msra.mxu1 %v1246_v27 }
  0x89   : > { %447 = vmatprep.subr.bf16.mxu0 %v1225_v10  ;;  %1098 = vmatprep.subr.bf16.mxu1 %v1247_v28 }
  0x8c   : > { %448 = vmatpush1.bf16.msra.mxu0 %v1227_v11  ;;  %1099 = vmatpush3.bf16.msra.mxu1 %v1247_v28 }
  0x8d   : > { %449 = vmatprep.subr.bf16.mxu0 %v1228_v12  ;;  %1100 = vmatprep.subr.bf16.mxu1 %v1248_v29 }
  0x90   : > { %450 = vmatpush1.bf16.msra.mxu0 %v1230_v13  ;;  %1101 = vmatpush3.bf16.msra.mxu1 %v1248_v29 }
  0x91   : > { %451 = vmatprep.subr.bf16.mxu0 %v1231_v14  ;;  %1102 = vmatprep.subr.bf16.mxu1 %v1249_v30 }
  0x94   : > { %452 = vmatpush1.bf16.msra.mxu0 %v1233_v15  ;;  %1103 = vmatpush3.bf16.msra.mxu1 %v1249_v30 }
  0x95   : > { %453 = vmatprep.subr.bf16.mxu0 %v1234_v16  ;;  %1104 = vmatprep.subr.bf16.mxu1 %v1250_v31 }
  0x98   : > { %454 = vmatpush1.bf16.msra.mxu0 %v1236_v17  ;;  %1105 = vmatpush3.bf16.msra.mxu1 %v1250_v31 }
  0x99   : > { %1106 = vmatprep.subr.bf16.mxu1 %v1251_v32 }
  0x9b   : > { %472 = vmatmul.mubr.bf16.vlgmr.msra.gmra.mrb[0].mxu0 %v1237_v18 }
  0x9c   : > { %481 = vmatprep.mubr.bf16.mxu0 %v1500_v3  ;;  %1107 = vmatpush3.bf16.msra.mxu1 %v1251_v32 }
  0x9d   : > { %1108 = vmatprep.subr.bf16.mxu1 %v1252_v33 }
  0xa0   : > { %1109 = vmatpush3.bf16.msra.mxu1 %v1252_v33 }
  0xa3   : > { %482 = vmatmul.mubr.bf16.gmra.mrb[4].mxu0 %v1238_v19 }
  0xa4   : > { %491 = vmatprep.mubr.bf16.mxu0 %v1500_v3 }
  0xab   : > { %492 = vmatmul.mubr.bf16.gmra.mrb[8].mxu0 %v1239_v20 }
  0xac   : > { %501 = vmatprep.mubr.bf16.mxu0 %v1500_v3 }
  0xb3   : > { %502 = vmatmul.mubr.bf16.gmra.mrb[12].mxu0 %v1240_v21 }
  0xb4   : > { %511 = vmatprep.mubr.bf16.mxu0 %v1500_v3 }
  0xbb   : > { %512 = vmatmul.mubr.bf16.gmra.mrb[16].mxu0 %v1241_v22 }
  0xbc   : > { %521 = vmatprep.mubr.bf16.mxu0 %v1500_v3 }
  0xc3   : > { %522 = vmatmul.mubr.bf16.gmra.mrb[20].mxu0 %v1242_v23 }
  0xc4   : > { %531 = vmatprep.mubr.bf16.mxu0 %v1500_v3 }
  0xcb   : > { %532 = vmatmul.mubr.bf16.gmra.mrb[24].mxu0 %v1243_v24 }
  0xcc   : > { %541 = vmatprep.mubr.bf16.mxu0 %v1500_v3 }
  0xd3   : > { %542 = vmatmul.mubr.bf16.gmra.mrb[28].mxu0 %v1244_v25 }
 0x16e   : > { %v473_v34 = vpop.f32.mrb[0].mxu0 }
 0x16f   : > { %v552_v35 = vsub.f32 0.0, %v473_v34  ;;  %v475_v36 = vpop.f32.mrb[1].mxu0 }
 0x170   : > { %v477_v37 = vpop.f32.mrb[2].mxu0 }
 0x171   : > { %v568_v38 = vmul.f32 1.442695, %v552_v35  ;;  %v553_v39 = vsub.f32 0.0, %v477_v37  ;;  %v479_v40 = vpop.f32.mrb[3].mxu0 }
 0x173   : > { %1253 = vpow2.f32 %v568_v38  ;;  %v570_v41 = vmul.f32 1.442695, %v553_v39 }
 0x175   : > { %1255 = vpow2.f32 %v570_v41 }
 0x176   : > { %v1741_v42 = vpop.f32.mrb[4].mxu0 }
 0x177   : > { %v554_v43 = vsub.f32 0.0, %v1741_v42  ;;  %v1744_v44 = vpop.f32.mrb[5].mxu0 }
 0x178   : > { %v1746_v45 = vpop.f32.mrb[6].mxu0 }
 0x179   : > { %v572_v46 = vmul.f32 1.442695, %v554_v43  ;;  %v555_v47 = vsub.f32 0.0, %v1746_v45  ;;  %v1749_v48 = vpop.f32.mrb[7].mxu0 }
 0x17b   : > { %1257 = vpow2.f32 %v572_v46  ;;  %v574_v49 = vmul.f32 1.442695, %v555_v47 }
 0x17d   : > { %v1254_v50 = vpop.eup %1253  ;;  %1259 = vpow2.f32 %v574_v49 }
 0x17e   : > { %v600_v51 = vadd.f32 1.0, %v1254_v50  ;;  %v1751_v52 = vpop.f32.mrb[8].mxu0 }
 0x17f   : > { %v1256_v53 = vpop.eup %1255  ;;  %v556_v54 = vsub.f32 0.0, %v1751_v52  ;;  %v1754_v55 = vpop.f32.mrb[9].mxu0 }
 0x180   : > { %1261 = vrcp.f32 %v600_v51  ;;  %v601_v56 = vadd.f32 1.0, %v1256_v53  ;;  %v1756_v57 = vpop.f32.mrb[10].mxu0 }
 0x181   : > { %v576_v58 = vmul.f32 1.442695, %v556_v54  ;;  %v557_v59 = vsub.f32 0.0, %v1756_v57  ;;  %v1759_v60 = vpop.f32.mrb[11].mxu0 }
 0x182   : > { %1263 = vrcp.f32 %v601_v56 }
 0x183   : > { %1265 = vpow2.f32 %v576_v58  ;;  %v578_v61 = vmul.f32 1.442695, %v557_v59 }
 0x185   : > { %v1258_v62 = vpop.eup %1257  ;;  %1267 = vpow2.f32 %v578_v61 }
 0x186   : > { %v602_v63 = vadd.f32 1.0, %v1258_v62  ;;  %v1761_v0 = vpop.f32.mrb[12].mxu0 }
 0x187   : > { %v1260_v1 = vpop.eup %1259  ;;  %v558_v2 = vsub.f32 0.0, %v1761_v0  ;;  %v1764_v3 = vpop.f32.mrb[13].mxu0 }
 0x188   : > { %1269 = vrcp.f32 %v602_v63  ;;  %v603_v4 = vadd.f32 1.0, %v1260_v1  ;;  %v1766_v5 = vpop.f32.mrb[14].mxu0 }
 0x189   : > { %v580_v6 = vmul.f32 1.442695, %v558_v2  ;;  %v559_v7 = vsub.f32 0.0, %v1766_v5  ;;  %v1769_v8 = vpop.f32.mrb[15].mxu0 }
 0x18a   : > { %v1262_v9 = vpop.eup %1261  ;;  %1271 = vrcp.f32 %v603_v4 }
 0x18b   : > { %v632_v10 = vmul.f32 %v1262_v9, %v473_v34  ;;  %1273 = vpow2.f32 %v580_v6  ;;  %v582_v11 = vmul.f32 1.442695, %v559_v7 }
 0x18c   : > { %v1264_v12 = vpop.eup %1263 }
 0x18d   : > { %v1266_v13 = vpop.eup %1265  ;;  %v648_v14 = vmul.f32 %v632_v10, %v475_v36  ;;  %v633_v15 = vmul.f32 %v1264_v12, %v477_v37  ;;  %1275 = vpow2.f32 %v582_v11 }
 0x18e   : > { %v604_v16 = vadd.f32 1.0, %v1266_v13  ;;  %v1771_v17 = vpop.f32.mrb[16].mxu0 }
 0x18f   : > { %v1268_v18 = vpop.eup %1267  ;;  %v649_v19 = vmul.f32 %v633_v15, %v479_v40  ;;  %v560_v20 = vsub.f32 0.0, %v1771_v17  ;;  %v1774_v21 = vpop.f32.mrb[17].mxu0 }
 0x190   : > { %1277 = vrcp.f32 %v604_v16  ;;  %v605_v22 = vadd.f32 1.0, %v1268_v18  ;;  %v1776_v23 = vpop.f32.mrb[18].mxu0 }
 0x191   : > { %v584_v24 = vmul.f32 1.442695, %v560_v20  ;;  %v561_v25 = vsub.f32 0.0, %v1776_v23  ;;  %v1779_v26 = vpop.f32.mrb[19].mxu0  ;;  %v680_v27 = vpack.c.bf16 %v649_v19, %v648_v14 }
 0x192   : > { %v1270_v28 = vpop.eup %1269  ;;  %1279 = vrcp.f32 %v605_v22 }
 0x193   : > { %v634_v29 = vmul.f32 %v1270_v28, %v1741_v42  ;;  %1281 = vpow2.f32 %v584_v24  ;;  %v586_v30 = vmul.f32 1.442695, %v561_v25  ;;  %1110 = vmatprep.mubr.bf16.mxu1 %v680_v27 }
 0x194   : > { %v1272_v31 = vpop.eup %1271 }
 0x195   : > { %v1274_v32 = vpop.eup %1273  ;;  %v650_v33 = vmul.f32 %v634_v29, %v1744_v44  ;;  %v635_v34 = vmul.f32 %v1272_v31, %v1746_v45  ;;  %1283 = vpow2.f32 %v586_v30 }
 0x196   : > { %v606_v35 = vadd.f32 1.0, %v1274_v32  ;;  %v1784_v36 = vpop.f32.mrb[20].mxu0 }
 0x197   : > { %v1276_v37 = vpop.eup %1275  ;;  %v651_v38 = vmul.f32 %v635_v34, %v1749_v48  ;;  %v562_v39 = vsub.f32 0.0, %v1784_v36  ;;  %v1788_v40 = vpop.f32.mrb[21].mxu0 }
 0x198   : > { %1285 = vrcp.f32 %v606_v35  ;;  %v607_v41 = vadd.f32 1.0, %v1276_v37  ;;  %v1790_v42 = vpop.f32.mrb[22].mxu0 }
 0x199   : > { %v681_v43 = vpack.c.bf16 %v651_v38, %v650_v33  ;;  %v588_v46 = vmul.f32 1.442695, %v562_v39  ;;  %v563_v44 = vsub.f32 0.0, %v1790_v42  ;;  %v1793_v45 = vpop.f32.mrb[23].mxu0 }
 0x19a   : > { %v1278_v47 = vpop.eup %1277  ;;  %1287 = vrcp.f32 %v607_v41 }
 0x19b   : > { %v636_v49 = vmul.f32 %v1278_v47, %v1751_v52  ;;  %1289 = vpow2.f32 %v588_v46  ;;  %v590_v48 = vmul.f32 1.442695, %v563_v44  ;;  %1111 = vmatmul.mubr.bf16.vlgmr.msra.gmra.mrb[0].mxu1 %v681_v43 }
 0x19c   : > { %v1280_v50 = vpop.eup %1279 }
 0x19d   : > { %v1282_v51 = vpop.eup %1281  ;;  %v652_v53 = vmul.f32 %v636_v49, %v1754_v55  ;;  %v637_v54 = vmul.f32 %v1280_v50, %v1756_v57  ;;  %1291 = vpow2.f32 %v590_v48 }
 0x19e   : > { %v608_v56 = vadd.f32 1.0, %v1282_v51  ;;  %v1798_v58 = vpop.f32.mrb[24].mxu0 }
 0x19f   : > { %v1284_v59 = vpop.eup %1283  ;;  %v653_v61 = vmul.f32 %v637_v54, %v1759_v60  ;;  %v564_v62 = vsub.f32 0.0, %v1798_v58  ;;  %v1802_v63 = vpop.f32.mrb[25].mxu0 }
 0x1a0   : > { %1293 = vrcp.f32 %v608_v56  ;;  %v609_v52 = vadd.f32 1.0, %v1284_v59  ;;  %v1804_v1 = vpop.f32.mrb[26].mxu0 }
 0x1a1   : > { %v682_v2 = vpack.c.bf16 %v653_v61, %v652_v53  ;;  %v592_v4 = vmul.f32 1.442695, %v564_v62  ;;  %v565_v55 = vsub.f32 0.0, %v1804_v1  ;;  %v1807_v57 = vpop.f32.mrb[27].mxu0 }
 0x1a2   : > { %v1286_v6 = vpop.eup %1285  ;;  %1295 = vrcp.f32 %v609_v52  ;;  %v666_v52 = vld [vmem:[#allocation2 + $0x10] sm:$0xff] }
 0x1a3   : > { %v638_v7 = vmul.f32 %v1286_v6, %v1761_v0  ;;  %1297 = vpow2.f32 %v592_v4  ;;  %v594_v60 = vmul.f32 1.442695, %v565_v55  ;;  %1114 = vmatprep.mubr.bf16.mxu1 %v682_v2  ;;  %v667_v4 = vld [vmem:[#allocation2 + $0x18] sm:$0xff]  ;;  %v665_v6 = vld [vmem:[#allocation2 + $0x8] sm:$0xff] }
 0x1a4   : > { %v1288_v9 = vpop.eup %1287 }
 0x1a5   : > { %v1290_v10 = vpop.eup %1289  ;;  %v654_v11 = vmul.f32 %v638_v7, %v1764_v3  ;;  %v639_v12 = vmul.f32 %v1288_v9, %v1766_v5  ;;  %1299 = vpow2.f32 %v594_v60 }
 0x1a6   : > { %v610_v13 = vadd.f32 1.0, %v1290_v10  ;;  %v543_v14 = vpop.f32.mrb[28].mxu0  ;;  %v670_v10 = vld [vmem:[#allocation2 + $0x30] sm:$0xff] }
 0x1a7   : > { %v1292_v15 = vpop.eup %1291  ;;  %v655_v16 = vmul.f32 %v639_v12, %v1769_v8  ;;  %v566_v18 = vsub.f32 0.0, %v543_v14  ;;  %v545_v19 = vpop.f32.mrb[29].mxu0 }
 0x1a8   : > { %1301 = vrcp.f32 %v610_v13  ;;  %v611_v20 = vadd.f32 1.0, %v1292_v15  ;;  %v547_v0 = vpop.f32.mrb[30].mxu0  ;;  %v671_v13 = vld [vmem:[#allocation2 + $0x38] sm:$0xff] }
 0x1a9   : > { %v683_v22 = vpack.c.bf16 %v655_v16, %v654_v11  ;;  %v596_v24 = vmul.f32 1.442695, %v566_v18  ;;  %v567_v25 = vsub.f32 0.0, %v547_v0  ;;  %v549_v27 = vpop.f32.mrb[31].mxu0  ;;  %v668_v11 = vld [vmem:[#allocation2 + $0x20] sm:$0xff]  ;;  %v669_v16 = vld [vmem:[#allocation2 + $0x28] sm:$0xff] }
 0x1aa   : > { %v1294_v28 = vpop.eup %1293  ;;  %1303 = vrcp.f32 %v611_v20 }
 0x1ab   : > { %v640_v3 = vmul.f32 %v1294_v28, %v1771_v17  ;;  %1305 = vpow2.f32 %v596_v24  ;;  %v598_v5 = vmul.f32 1.442695, %v567_v25  ;;  %1115 = vmatmul.mubr.bf16.gmra.mrb[4].mxu1 %v683_v22  ;;  %v674_v24 = vld [vmem:[#allocation2 + $0x50] sm:$0xff]  ;;  %v672_v25 = vld [vmem:[#allocation2 + $0x40] sm:$0xff]  ;;  %v675_v28 = vld [vmem:[#allocation2 + $0x58] sm:$0xff] }
 0x1ac   : > { %v1296_v29 = vpop.eup %1295 }
 0x1ad   : > { %v1298_v30 = vpop.eup %1297  ;;  %v656_v8 = vmul.f32 %v640_v3, %v1774_v21  ;;  %v641_v31 = vmul.f32 %v1296_v29, %v1776_v23  ;;  %1307 = vpow2.f32 %v598_v5  ;;  %v673_v29 = vld [vmem:[#allocation2 + $0x48] sm:$0xff] }
 0x1ae   : > { %v612_v32 = vadd.f32 1.0, %v1298_v30 }
 0x1af   : > { %v1300_v33 = vpop.eup %1299  ;;  %v657_v34 = vmul.f32 %v641_v31, %v1779_v26 }
 0x1b0   : > { %1309 = vrcp.f32 %v612_v32  ;;  %v613_v35 = vadd.f32 1.0, %v1300_v33 }
 0x1b1   : > { %v684_v37 = vpack.c.bf16 %v657_v34, %v656_v8  ;;  %v678_v34 = vld [vmem:[#allocation2 + $0x70] sm:$0xff] }
 0x1b2   : > { %v1302_v38 = vpop.eup %1301  ;;  %1311 = vrcp.f32 %v613_v35  ;;  %v676_v35 = vld [vmem:[#allocation2 + $0x60] sm:$0xff] }
 0x1b3   : > { %v642_v17 = vmul.f32 %v1302_v38, %v1784_v36  ;;  %1118 = vmatprep.mubr.bf16.mxu1 %v684_v37  ;;  %v679_v38 = vld [vmem:[#allocation2 + $0x78] sm:$0xff] }
 0x1b4   : > { %v1304_v39 = vpop.eup %1303 }
 0x1b5   : > { %v1306_v41 = vpop.eup %1305  ;;  %v658_v43 = vmul.f32 %v642_v17, %v1788_v40  ;;  %v643_v21 = vmul.f32 %v1304_v39, %v1790_v42 }
 0x1b6   : > { %v614_v23 = vadd.f32 1.0, %v1306_v41  ;;  %v677_v41 = vld [vmem:[#allocation2 + $0x68] sm:$0xff] }
 0x1b7   : > { %v1308_v46 = vpop.eup %1307  ;;  %v659_v44 = vmul.f32 %v643_v21, %v1793_v45 }
 0x1b8   : > { %1313 = vrcp.f32 %v614_v23  ;;  %v615_v26 = vadd.f32 1.0, %v1308_v46 }
 0x1b9   : > { %v685_v47 = vpack.c.bf16 %v659_v44, %v658_v43 }
 0x1ba   : > { %v1310_v49 = vpop.eup %1309  ;;  %1315 = vrcp.f32 %v615_v26 }
 0x1bb   : > { %v644_v48 = vmul.f32 %v1310_v49, %v1798_v58  ;;  %1119 = vmatmul.mubr.bf16.gmra.mrb[8].mxu1 %v685_v47  ;;  %v664_v58 = vld [vmem:[#allocation2] sm:$0xff] }
 0x1bc   : > { %v1312_v36 = vpop.eup %1311 }
 0x1bd   : > { %v660_v50 = vmul.f32 %v644_v48, %v1802_v63  ;;  %v645_v51 = vmul.f32 %v1312_v36, %v1804_v1 }
 0x1bf   : > { %v661_v40 = vmul.f32 %v645_v51, %v1807_v57 }
 0x1c1   : > { %v686_v42 = vpack.c.bf16 %v661_v40, %v660_v50 }
 0x1c2   : > { %v1314_v53 = vpop.eup %1313 }
 0x1c3   : > { %v646_v54 = vmul.f32 %v1314_v53, %v543_v14  ;;  %1122 = vmatprep.mubr.bf16.mxu1 %v686_v42 }
 0x1c4   : > { %v1316_v45 = vpop.eup %1315 }
 0x1c5   : > { %v662_v56 = vmul.f32 %v646_v54, %v545_v19  ;;  %v647_v59 = vmul.f32 %v1316_v45, %v547_v0 }
 0x1c7   : > { %v663_v61 = vmul.f32 %v647_v59, %v549_v27 }
 0x1c9   : > { %v687_v62 = vpack.c.bf16 %v663_v61, %v662_v56 }
 0x1cb   : > { %1123 = vmatmul.mubr.bf16.gmra.mrb[12].mxu1 %v687_v62 }
 0x26e   : > { %v1112_v2 = vpop.f32.mrb[0].mxu1 }
 0x26f   : > { %v851_v55 = vadd.f32 %v1112_v2, %v666_v52  ;;  %v786_v63 = vpop.f32.mrb[1].mxu1 }
 0x270   : > { %v849_v1 = vadd.f32 %v786_v63, %v664_v58  ;;  %v1113_v7 = vpop.f32.mrb[2].mxu1 }
 0x271   : > { %867 = vst [vmem:[#allocation2 + $0x10] sm:$0xff] %v851_v55  ;;  %v852_v57 = vadd.f32 %v1113_v7, %v667_v4  ;;  %v789_v60 = vpop.f32.mrb[3].mxu1 }
 0x272   : > { %865 = vst [vmem:[#allocation2] sm:$0xff] %v849_v1  ;;  %v850_v9 = vadd.f32 %v789_v60, %v665_v6 }
 0x273   : > { %868 = vst [vmem:[#allocation2 + $0x18] sm:$0xff] %v852_v57 }
 0x274   : > { %866 = vst [vmem:[#allocation2 + $0x8] sm:$0xff] %v850_v9 }
 0x278   : > { %v887_v49 = vld [vmem:[#allocation2 + $0x10] sm:$0xff] (!%p1071_p0) }
 0x279   : > { %v885_v26 = vld [vmem:[#allocation2] sm:$0xff] (!%p1071_p0)  ;;  %903 = vst [vmem:[#allocation9 + $0x10] sm:$0xff] (!%p1071_p0), %v887_v49 }
 0x27a   : > { %901 = vst [vmem:[#allocation9] sm:$0xff] (!%p1071_p0), %v885_v26  ;;  %v888_v48 = vld [vmem:[#allocation2 + $0x18] sm:$0xff] (!%p1071_p0) }
 0x27b   : > { %v886_v47 = vld [vmem:[#allocation2 + $0x8] sm:$0xff] (!%p1071_p0)  ;;  %904 = vst [vmem:[#allocation9 + $0x18] sm:$0xff] (!%p1071_p0), %v888_v48 }
 0x27c   : > { %902 = vst [vmem:[#allocation9 + $0x8] sm:$0xff] (!%p1071_p0), %v886_v47 }
 0x27e   : > { %v1116_v12 = vpop.f32.mrb[4].mxu1 }
 0x27f   : > { %v855_v14 = vadd.f32 %v1116_v12, %v670_v10  ;;  %v802_v15 = vpop.f32.mrb[5].mxu1 }
 0x280   : > { %v853_v18 = vadd.f32 %v802_v15, %v668_v11  ;;  %v1117_v19 = vpop.f32.mrb[6].mxu1 }
 0x281   : > { %871 = vst [vmem:[#allocation2 + $0x30] sm:$0xff] %v855_v14  ;;  %v856_v20 = vadd.f32 %v1117_v19, %v671_v13  ;;  %v805_v0 = vpop.f32.mrb[7].mxu1 }
 0x282   : > { %869 = vst [vmem:[#allocation2 + $0x20] sm:$0xff] %v853_v18  ;;  %v854_v22 = vadd.f32 %v805_v0, %v669_v16 }
 0x283   : > { %872 = vst [vmem:[#allocation2 + $0x38] sm:$0xff] %v856_v20 }
 0x284   : > { %870 = vst [vmem:[#allocation2 + $0x28] sm:$0xff] %v854_v22 }
 0x288   : > { %v891_v51 = vld [vmem:[#allocation2 + $0x30] sm:$0xff] (!%p1071_p0) }
 0x289   : > { %v889_v36 = vld [vmem:[#allocation2 + $0x20] sm:$0xff] (!%p1071_p0)  ;;  %907 = vst [vmem:[#allocation9 + $0x30] sm:$0xff] (!%p1071_p0), %v891_v51 }
 0x28a   : > { %905 = vst [vmem:[#allocation9 + $0x20] sm:$0xff] (!%p1071_p0), %v889_v36  ;;  %v892_v40 = vld [vmem:[#allocation2 + $0x38] sm:$0xff] (!%p1071_p0) }
 0x28b   : > { %v890_v50 = vld [vmem:[#allocation2 + $0x28] sm:$0xff] (!%p1071_p0)  ;;  %908 = vst [vmem:[#allocation9 + $0x38] sm:$0xff] (!%p1071_p0), %v892_v40 }
 0x28c   : > { %906 = vst [vmem:[#allocation9 + $0x28] sm:$0xff] (!%p1071_p0), %v890_v50 }
 0x28e   : > { %v1120_v27 = vpop.f32.mrb[8].mxu1 }
 0x28f   : > { %v859_v3 = vadd.f32 %v1120_v27, %v674_v24  ;;  %v818_v5 = vpop.f32.mrb[9].mxu1 }
 0x290   : > { %v857_v30 = vadd.f32 %v818_v5, %v672_v25  ;;  %v1121_v8 = vpop.f32.mrb[10].mxu1 }
 0x291   : > { %875 = vst [vmem:[#allocation2 + $0x50] sm:$0xff] %v859_v3  ;;  %v860_v31 = vadd.f32 %v1121_v8, %v675_v28  ;;  %v821_v32 = vpop.f32.mrb[11].mxu1 }
 0x292   : > { %873 = vst [vmem:[#allocation2 + $0x40] sm:$0xff] %v857_v30  ;;  %v858_v33 = vadd.f32 %v821_v32, %v673_v29 }
 0x293   : > { %876 = vst [vmem:[#allocation2 + $0x58] sm:$0xff] %v860_v31 }
 0x294   : > { %874 = vst [vmem:[#allocation2 + $0x48] sm:$0xff] %v858_v33 }
 0x298   : > { %v895_v54 = vld [vmem:[#allocation2 + $0x50] sm:$0xff] (!%p1071_p0) }
 0x299   : > { %v893_v42 = vld [vmem:[#allocation2 + $0x40] sm:$0xff] (!%p1071_p0)  ;;  %911 = vst [vmem:[#allocation9 + $0x50] sm:$0xff] (!%p1071_p0), %v895_v54 }
 0x29a   : > { %909 = vst [vmem:[#allocation9 + $0x40] sm:$0xff] (!%p1071_p0), %v893_v42  ;;  %v896_v45 = vld [vmem:[#allocation2 + $0x58] sm:$0xff] (!%p1071_p0) }
 0x29b   : > { %v894_v53 = vld [vmem:[#allocation2 + $0x48] sm:$0xff] (!%p1071_p0)  ;;  %912 = vst [vmem:[#allocation9 + $0x58] sm:$0xff] (!%p1071_p0), %v896_v45 }
 0x29c   : > { %910 = vst [vmem:[#allocation9 + $0x48] sm:$0xff] (!%p1071_p0), %v894_v53 }
 0x29e   : > { %v1124_v37 = vpop.f32.mrb[12].mxu1  ;;  %884 = sbr.rel (%p1071_p0) target bundleno = 685 (0x2ad), region = 52 }
 0x29f   : > { %v863_v17 = vadd.f32 %v1124_v37, %v678_v34  ;;  %v834_v39 = vpop.f32.mrb[13].mxu1 }
 0x2a0   : > { %v861_v43 = vadd.f32 %v834_v39, %v676_v35  ;;  %v1125_v21 = vpop.f32.mrb[14].mxu1 }
 0x2a1   : > { %879 = vst [vmem:[#allocation2 + $0x70] sm:$0xff] %v863_v17  ;;  %v864_v23 = vadd.f32 %v1125_v21, %v679_v38  ;;  %v837_v46 = vpop.f32.mrb[15].mxu1 }
 0x2a2   : > { %877 = vst [vmem:[#allocation2 + $0x60] sm:$0xff] %v861_v43  ;;  %v862_v44 = vadd.f32 %v837_v46, %v677_v41 }
 0x2a3   : > { %880 = vst [vmem:[#allocation2 + $0x78] sm:$0xff] %v864_v23 }
 0x2a4   : > { %878 = vst [vmem:[#allocation2 + $0x68] sm:$0xff] %v862_v44 }
 0x2a8   : > { %v899_v61 = vld [vmem:[#allocation2 + $0x70] sm:$0xff] }
 0x2a9   : > { %v897_v56 = vld [vmem:[#allocation2 + $0x60] sm:$0xff]  ;;  %915 = vst [vmem:[#allocation9 + $0x70] sm:$0xff] %v899_v61 }
 0x2aa   : > { %913 = vst [vmem:[#allocation9 + $0x60] sm:$0xff] %v897_v56  ;;  %v900_v62 = vld [vmem:[#allocation2 + $0x78] sm:$0xff] }
 0x2ab   : > { %v898_v59 = vld [vmem:[#allocation2 + $0x68] sm:$0xff]  ;;  %916 = vst [vmem:[#allocation9 + $0x78] sm:$0xff] %v900_v62 }
 0x2ac   : > { %914 = vst [vmem:[#allocation9 + $0x68] sm:$0xff] %v898_v59 }
 0x2ad PF: > { %p1152_p5 = scmp.eq.s32.totalorder %s1612_s30, 1  ;;  %s1501_s15 = smov [#allocation9]  }
 0x2ae   : > { %s926_s6 = sshll.u32 %s1501_s15, 4  ;;  %s927_s6 = int_to_ptr.vmem [resolvable:$true] %s926_s6 }
 0x2af   : > { %s1405_s19 = scalar_lea.vmem %s927_s6, 2048  ;;  %p1412_p13 = scmp.lt.s32.totalorder %s927_s6, %s927_s6 }
 0x2b0   : > { %p1406_p1 = scmp.ne.s32.totalorder %s927_s6, %s1405_s19  ;;  %p1413_p2 = scmp.lt.s32.totalorder %s1405_s19, %s1405_s19 }
 0x2b2   : > { %p1407_p4 = pnand %p1406_p1, %p1152_p5  ;;  %p1414_p7 = por %p1413_p2, %p1412_p13 }
 0x2b4   : > { %p1408_p8 = pneg %p1407_p4 }
 0x2b6   : > { %p1415_p9 = pnand %p1414_p7, %p1408_p8 }
 0x2b8   : > { %1418 = shalt.err (!%p1415_p9)
}
 0x2b9   : > { %s1419_s11 = scalar_lea.hbm %s1870_s3, 2048 }
 0x2ba   : > { %p1420_p3 = scmp.ne.s32.totalorder %s1870_s3, %s1419_s11  ;;  %p1425_p10 = scmp.lt.u32.totalorder %s1419_s11, %s1870_s3 }
 0x2bc   : > { %p1421_p11 = pnand %p1420_p3, %p1152_p5 }
 0x2be   : > { %p1422_p12 = pneg %p1421_p11 }
 0x2c0   : > { %p1427_p6 = pnand %p1425_p10, %p1422_p12 }
 0x2c2   : > { %1430 = shalt.err (!%p1427_p6)
}
 0x2c3   : > { %s1502_s9 = smov 128   ;;  %s1503_s12 = smov 8  }
 0x2c4   : > { %1135 = dma.vmem_to_hbm [thread:$0]  (%p1152_p5), %s927_s6, 2048, %s1870_s3, [#allocation5], %s1502_s9, %s1502_s9, %s1503_s12  }
 0x2c5   : > { %1464 = dma.done.wait (%p1152_p5), [#allocation5], 2048  }
 0x2c6   : > { %1466 = vsyncadd (%p1152_p5), [#allocation5], 4294965248 }
 0x2c7 PF: > { %s18_s17 = sadd.s32 1, %s1489_s17   ;;  %s1888_s12 = smov %s1473_s13 }
 0x2c8   : > { %p15_p0 = scmp.ge.s32.totalorder %s18_s17, 4   ;;  %s1889_s13 = smov %s1477_s14 }
 0x2c9   : > { %s1890_s14 = smov %s1568_s24  ;;  %s1891_s15 = smov %s1485_s16 }
 0x2ca   : > { %s1892_s16 = smov %s1894_s18  ;;  %17 = sbr.rel (!%p15_p0) target bundleno = 6 (0x6), region = 95 }
 0x2d1   :  { %942 = vsyncpa [#allocation4], 1 }
 0x2d2   :  { %944 = vsyncpa [#allocation4 + $0x1], 1 }
 0x2d3   :  { %945 = vsyncpa [#allocation7], 1 }
 0x2d4   :  { %947 = vsyncpa [#allocation7 + $0x1], 1 }
 0x2d5   :  { %948 = vsyncpa [#allocation5], 1 }
 0x2d6   :  { %950 = vsyncpa [#allocation5 + $0x1], 1 }

</bundles_post_ra>
